<compile_context>
chip_gen: v6e
topology: v6e:2x2x1
jax: 0.10.0
libtpu: 0.0.40
codegen_flags: <defaults>
</compile_context>

<pallas_src>
import functools

import numpy as np

import jax
import jax.numpy as jnp
from jax import lax
from jax.experimental import pallas as pl
from jax.experimental.pallas import tpu as pltpu


def rnn_seq_kernel(ids_ref,        # SMEM [S] int32 (scalar prefetch)
                   wxb_h_ref,      # VMEM [I, H]     Wx_i2h rows with b_i2h folded in
                   wh_h_ref,       # VMEM [H, H]     hidden->hidden weights
                   wxbo_ref,       # VMEM [I, O_PAD] Wx_i2o rows with b_i2o folded in
                   wh_o_ref,       # VMEM [H, O_PAD] hidden->logits weights
                   h0_ref,         # VMEM [1, H]     initial hidden
                   out_ref,        # VMEM [1, O_PAD] final log-probs
                   h_final_ref,    # VMEM [1, H]     final hidden
                   *, num_outputs):
    S = ids_ref.shape[0]           # static trip count

    def step(t, h):
        letter = ids_ref[t]                               # scalar from SMEM
        # one-hot x @ Wx  ==  selected (bias-folded) row of Wx, loaded from VMEM
        x_row = wxb_h_ref[pl.ds(letter, 1), :]            # [1, H]
        return x_row + jnp.dot(h, wh_h_ref[...],
                               preferred_element_type=jnp.float32)

    # Recurrence over the first S-1 steps; hidden carried in registers.
    h = h0_ref[...]                                       # [1, H]
    if S > 1:
        h = lax.fori_loop(0, S - 1, step, h, unroll=True)

    # Last step: logits use (x_{S-1}, h entering step S-1); hidden is updated too.
    last = S - 1
    letter_last = ids_ref[last]
    logits = (wxbo_ref[pl.ds(letter_last, 1), :]
              + jnp.dot(h, wh_o_ref[...], preferred_element_type=jnp.float32))
    h_final_ref[...] = step(last, h)

    # Masked, numerically stable log_softmax over the lane-padded logits.
    o_pad = logits.shape[-1]
    col = lax.broadcasted_iota(jnp.int32, (1, o_pad), 1)
    logits = jnp.where(col < num_outputs, logits, jnp.float32(-1e30))
    m = jnp.max(logits, axis=-1, keepdims=True)
    shifted = logits - m
    lse = jnp.log(jnp.sum(jnp.exp(shifted), axis=-1, keepdims=True))
    out_ref[...] = shifted - lse


@jax.jit
def rnn_forward_sequence(input_seq, h0, w_i2h, b_i2h, w_i2o, b_i2o):
    """Run the RNN over a whole sequence in one fused Pallas kernel.

    input_seq: [S, 1, I] float32 one-hot rows (line_to_tensor output)
    h0:        [1, H] float32
    w_i2h: [H, I+H], b_i2h: [H]   (PyTorch nn.Linear layout)
    w_i2o: [O, I+H], b_i2o: [O]
    Returns (final_log_probs [1, O], final_hidden [1, H]).
    """
    S, B, I = input_seq.shape
    assert B == 1, "module semantics are batch=1"
    H = h0.shape[-1]
    O = w_i2o.shape[0]
    O_PAD = max(128, ((O + 127) // 128) * 128)     # lane-dense logits
    pad_o = O_PAD - O

    # ---- one-time weight prep (hoisted out of the hot path) ------------------
    wx_h = jnp.transpose(w_i2h[:, :I])             # [I, H]
    wh_h = jnp.transpose(w_i2h[:, I:])             # [H, H]
    wx_o = jnp.transpose(w_i2o[:, :I])             # [I, O]
    wh_o = jnp.transpose(w_i2o[:, I:])             # [H, O]
    wxb_h = wx_h + b_i2h[None, :]                                    # [I, H]
    wxbo = jnp.pad(wx_o + b_i2o[None, :], ((0, 0), (0, pad_o)))      # [I, O_PAD]
    wh_o_pad = jnp.pad(wh_o, ((0, 0), (0, pad_o)))                   # [H, O_PAD]

    # One-hot input -> letter ids (scalar prefetch, consumed by the kernel).
    # TODO(synk): assumes line_to_tensor-style one-hot rows; general dense
    # inputs would need the x @ Wx matmul instead of the row gather.
    ids = jnp.argmax(input_seq[:, 0, :], axis=-1).astype(jnp.int32)  # [S]

    kernel = functools.partial(rnn_seq_kernel, num_outputs=O)

    grid_spec = pltpu.PrefetchScalarGridSpec(
        num_scalar_prefetch=1,
        grid=(1,),                                  # whole sequence in one step
        in_specs=[
            pl.BlockSpec((I, H), lambda i, ids: (0, 0)),
            pl.BlockSpec((H, H), lambda i, ids: (0, 0)),
            pl.BlockSpec((I, O_PAD), lambda i, ids: (0, 0)),
            pl.BlockSpec((H, O_PAD), lambda i, ids: (0, 0)),
            pl.BlockSpec((1, H), lambda i, ids: (0, 0)),
        ],
        out_specs=(
            pl.BlockSpec((1, O_PAD), lambda i, ids: (0, 0)),
            pl.BlockSpec((1, H), lambda i, ids: (0, 0)),
        ),
    )

    out_pad, h_fin = pl.pallas_call(
        kernel,
        out_shape=(jax.ShapeDtypeStruct((1, O_PAD), jnp.float32),
                   jax.ShapeDtypeStruct((1, H), jnp.float32)),
        grid_spec=grid_spec,
        compiler_params=pltpu.CompilerParams(
            dimension_semantics=("arbitrary",)),
    )(ids, wxb_h, wh_h, wxbo, wh_o_pad, h0)

    return out_pad[:, :O], h_fin


def rnn_reference(input_seq, h0, w_i2h, b_i2h, w_i2o, b_i2o):
    """Plain-JAX reference with the exact PyTorch module math (per-step)."""
    h = h0
    out = None
    for t in range(input_seq.shape[0]):
        combined = jnp.concatenate([input_seq[t], h], axis=1)
        new_h = combined @ w_i2h.T + b_i2h
        logits = combined @ w_i2o.T + b_i2o
        out = jax.nn.log_softmax(logits, axis=1)
        h = new_h
    return out, h


if __name__ == "__main__":
    # Shapes implied by the module: N_LETTERS=57, n_hidden=128, n_categories=18.
    N_LETTERS = 57
    N_HIDDEN = 128
    N_CATEGORIES = 18
    SEQ_LEN = 8  # e.g. a name of 8 letters, one one-hot vector per step

    key = jax.random.PRNGKey(0)
    k_in, k_wh, k_bh, k_wo, k_bo = jax.random.split(key, 5)

    # Deterministic "line_to_tensor"-like input: [seq, 1, N_LETTERS] one-hot.
    letter_ids = jax.random.randint(k_in, (SEQ_LEN,), 0, N_LETTERS)
    input_seq = jax.nn.one_hot(letter_ids, N_LETTERS, dtype=jnp.float32)
    input_seq = input_seq.reshape(SEQ_LEN, 1, N_LETTERS)

    # Deterministic parameter init (PyTorch Linear: U(-1/sqrt(fan_in), +1/sqrt(fan_in))).
    fan_in = N_LETTERS + N_HIDDEN
    bound = float(1.0 / np.sqrt(fan_in))
    w_i2h = jax.random.uniform(k_wh, (N_HIDDEN, fan_in), jnp.float32, -bound, bound)
    b_i2h = jax.random.uniform(k_bh, (N_HIDDEN,), jnp.float32, -bound, bound)
    w_i2o = jax.random.uniform(k_wo, (N_CATEGORIES, fan_in), jnp.float32, -bound, bound)
    b_i2o = jax.random.uniform(k_bo, (N_CATEGORIES,), jnp.float32, -bound, bound)

    # init_hidden(): zeros(1, hidden_size)
    hidden0 = jnp.zeros((1, N_HIDDEN), jnp.float32)

    output, hidden = rnn_forward_sequence(input_seq, hidden0,
                                          w_i2h, b_i2h, w_i2o, b_i2o)
    output = jax.block_until_ready(output)
    hidden = jax.block_until_ready(hidden)

    # Correctness check against the exact cat([x,h]) @ W^T reference (all f32).
    ref_out, ref_h = rnn_reference(input_seq, hidden0, w_i2h, b_i2h, w_i2o, b_i2o)
    np.testing.assert_allclose(np.asarray(output), np.asarray(ref_out),
                               rtol=1e-3, atol=1e-3)
    np.testing.assert_allclose(np.asarray(hidden), np.asarray(ref_h),
                               rtol=1e-3, atol=1e-3)

    assert output.shape == (1, N_CATEGORIES)
    assert hidden.shape == (1, N_HIDDEN)
    print("KERNEL_OK")
</pallas_src>

<mosaic_0001>
module attributes {stable_mosaic.version = 11 : i64} {
  func.func @rnn_seq_kernel(%arg0: i32, %arg1: memref<8xi32, #tpu.memory_space<smem>>, %arg2: memref<57x128xf32, #tpu.memory_space<vmem>>, %arg3: memref<128x128xf32, #tpu.memory_space<vmem>>, %arg4: memref<57x128xf32, #tpu.memory_space<vmem>>, %arg5: memref<128x128xf32, #tpu.memory_space<vmem>>, %arg6: memref<1x128xf32, #tpu.memory_space<vmem>>, %arg7: memref<1x128xf32, #tpu.memory_space<vmem>>, %arg8: memref<1x128xf32, #tpu.memory_space<vmem>>) attributes {dimension_semantics = [#tpu.dimension_semantics<arbitrary>], iteration_bounds = array<i64: 1>, scalar_prefetch = 1 : i64, scratch_operands = 0 : i64, tpu.core_type = #tpu.core_type<tc>, window_params = [{pipeline_mode = #tpu.pipeline_mode<synchronous>, transform_indices = @transform_0, window_bounds = array<i64: 57, 128>}, {pipeline_mode = #tpu.pipeline_mode<synchronous>, transform_indices = @transform_1, window_bounds = array<i64: 128, 128>}, {pipeline_mode = #tpu.pipeline_mode<synchronous>, transform_indices = @transform_2, window_bounds = array<i64: 57, 128>}, {pipeline_mode = #tpu.pipeline_mode<synchronous>, transform_indices = @transform_3, window_bounds = array<i64: 128, 128>}, {pipeline_mode = #tpu.pipeline_mode<synchronous>, transform_indices = @transform_4, window_bounds = array<i64: 1, 128>}, {pipeline_mode = #tpu.pipeline_mode<synchronous>, transform_indices = @transform_5, window_bounds = array<i64: 1, 128>}, {pipeline_mode = #tpu.pipeline_mode<synchronous>, transform_indices = @transform_6, window_bounds = array<i64: 1, 128>}]} {
    %c0 = arith.constant 0 : index
    %c0_0 = arith.constant 0 : index
    %0 = vector.load %arg6[%c0, %c0_0] : memref<1x128xf32, #tpu.memory_space<vmem>>, vector<1x128xf32>
    %c0_i32 = arith.constant 0 : i32
    %1 = arith.index_cast %c0_i32 : i32 to index
    %2 = memref.load %arg1[%1] : memref<8xi32, #tpu.memory_space<smem>>
    %3 = arith.index_cast %2 : i32 to index
    %c0_1 = arith.constant 0 : index
    %4 = vector.load %arg2[%3, %c0_1] : memref<57x128xf32, #tpu.memory_space<vmem>>, vector<1x128xf32>
    %c0_2 = arith.constant 0 : index
    %c0_3 = arith.constant 0 : index
    %5 = vector.load %arg3[%c0_2, %c0_3] : memref<128x128xf32, #tpu.memory_space<vmem>>, vector<128x128xf32>
    %cst = arith.constant dense<0.000000e+00> : vector<1x128xf32>
    %6 = tpu.matmul %0, %5, %cst {dimension_numbers = #tpu.dot_dimension_numbers<[1], [0], [0], [1], [0, 0, 1, 1], [], []>} : vector<1x128xf32>, vector<128x128xf32>, vector<1x128xf32> -> vector<1x128xf32>
    %7 = arith.addf %4, %6 : vector<1x128xf32>
    %c1_i32 = arith.constant 1 : i32
    %8 = arith.index_cast %c1_i32 : i32 to index
    %9 = memref.load %arg1[%8] : memref<8xi32, #tpu.memory_space<smem>>
    %10 = arith.index_cast %9 : i32 to index
    %c0_4 = arith.constant 0 : index
    %11 = vector.load %arg2[%10, %c0_4] : memref<57x128xf32, #tpu.memory_space<vmem>>, vector<1x128xf32>
    %c0_5 = arith.constant 0 : index
    %c0_6 = arith.constant 0 : index
    %12 = vector.load %arg3[%c0_5, %c0_6] : memref<128x128xf32, #tpu.memory_space<vmem>>, vector<128x128xf32>
    %cst_7 = arith.constant dense<0.000000e+00> : vector<1x128xf32>
    %13 = tpu.matmul %7, %12, %cst_7 {dimension_numbers = #tpu.dot_dimension_numbers<[1], [0], [0], [1], [0, 0, 1, 1], [], []>} : vector<1x128xf32>, vector<128x128xf32>, vector<1x128xf32> -> vector<1x128xf32>
    %14 = arith.addf %11, %13 : vector<1x128xf32>
    %c2_i32 = arith.constant 2 : i32
    %15 = arith.index_cast %c2_i32 : i32 to index
    %16 = memref.load %arg1[%15] : memref<8xi32, #tpu.memory_space<smem>>
    %17 = arith.index_cast %16 : i32 to index
    %c0_8 = arith.constant 0 : index
    %18 = vector.load %arg2[%17, %c0_8] : memref<57x128xf32, #tpu.memory_space<vmem>>, vector<1x128xf32>
    %c0_9 = arith.constant 0 : index
    %c0_10 = arith.constant 0 : index
    %19 = vector.load %arg3[%c0_9, %c0_10] : memref<128x128xf32, #tpu.memory_space<vmem>>, vector<128x128xf32>
    %cst_11 = arith.constant dense<0.000000e+00> : vector<1x128xf32>
    %20 = tpu.matmul %14, %19, %cst_11 {dimension_numbers = #tpu.dot_dimension_numbers<[1], [0], [0], [1], [0, 0, 1, 1], [], []>} : vector<1x128xf32>, vector<128x128xf32>, vector<1x128xf32> -> vector<1x128xf32>
    %21 = arith.addf %18, %20 : vector<1x128xf32>
    %c3_i32 = arith.constant 3 : i32
    %22 = arith.index_cast %c3_i32 : i32 to index
    %23 = memref.load %arg1[%22] : memref<8xi32, #tpu.memory_space<smem>>
    %24 = arith.index_cast %23 : i32 to index
    %c0_12 = arith.constant 0 : index
    %25 = vector.load %arg2[%24, %c0_12] : memref<57x128xf32, #tpu.memory_space<vmem>>, vector<1x128xf32>
    %c0_13 = arith.constant 0 : index
    %c0_14 = arith.constant 0 : index
    %26 = vector.load %arg3[%c0_13, %c0_14] : memref<128x128xf32, #tpu.memory_space<vmem>>, vector<128x128xf32>
    %cst_15 = arith.constant dense<0.000000e+00> : vector<1x128xf32>
    %27 = tpu.matmul %21, %26, %cst_15 {dimension_numbers = #tpu.dot_dimension_numbers<[1], [0], [0], [1], [0, 0, 1, 1], [], []>} : vector<1x128xf32>, vector<128x128xf32>, vector<1x128xf32> -> vector<1x128xf32>
    %28 = arith.addf %25, %27 : vector<1x128xf32>
    %c4_i32 = arith.constant 4 : i32
    %29 = arith.index_cast %c4_i32 : i32 to index
    %30 = memref.load %arg1[%29] : memref<8xi32, #tpu.memory_space<smem>>
    %31 = arith.index_cast %30 : i32 to index
    %c0_16 = arith.constant 0 : index
    %32 = vector.load %arg2[%31, %c0_16] : memref<57x128xf32, #tpu.memory_space<vmem>>, vector<1x128xf32>
    %c0_17 = arith.constant 0 : index
    %c0_18 = arith.constant 0 : index
    %33 = vector.load %arg3[%c0_17, %c0_18] : memref<128x128xf32, #tpu.memory_space<vmem>>, vector<128x128xf32>
    %cst_19 = arith.constant dense<0.000000e+00> : vector<1x128xf32>
    %34 = tpu.matmul %28, %33, %cst_19 {dimension_numbers = #tpu.dot_dimension_numbers<[1], [0], [0], [1], [0, 0, 1, 1], [], []>} : vector<1x128xf32>, vector<128x128xf32>, vector<1x128xf32> -> vector<1x128xf32>
    %35 = arith.addf %32, %34 : vector<1x128xf32>
    %c5_i32 = arith.constant 5 : i32
    %36 = arith.index_cast %c5_i32 : i32 to index
    %37 = memref.load %arg1[%36] : memref<8xi32, #tpu.memory_space<smem>>
    %38 = arith.index_cast %37 : i32 to index
    %c0_20 = arith.constant 0 : index
    %39 = vector.load %arg2[%38, %c0_20] : memref<57x128xf32, #tpu.memory_space<vmem>>, vector<1x128xf32>
    %c0_21 = arith.constant 0 : index
    %c0_22 = arith.constant 0 : index
    %40 = vector.load %arg3[%c0_21, %c0_22] : memref<128x128xf32, #tpu.memory_space<vmem>>, vector<128x128xf32>
    %cst_23 = arith.constant dense<0.000000e+00> : vector<1x128xf32>
    %41 = tpu.matmul %35, %40, %cst_23 {dimension_numbers = #tpu.dot_dimension_numbers<[1], [0], [0], [1], [0, 0, 1, 1], [], []>} : vector<1x128xf32>, vector<128x128xf32>, vector<1x128xf32> -> vector<1x128xf32>
    %42 = arith.addf %39, %41 : vector<1x128xf32>
    %c6_i32 = arith.constant 6 : i32
    %43 = arith.index_cast %c6_i32 : i32 to index
    %44 = memref.load %arg1[%43] : memref<8xi32, #tpu.memory_space<smem>>
    %45 = arith.index_cast %44 : i32 to index
    %c0_24 = arith.constant 0 : index
    %46 = vector.load %arg2[%45, %c0_24] : memref<57x128xf32, #tpu.memory_space<vmem>>, vector<1x128xf32>
    %c0_25 = arith.constant 0 : index
    %c0_26 = arith.constant 0 : index
    %47 = vector.load %arg3[%c0_25, %c0_26] : memref<128x128xf32, #tpu.memory_space<vmem>>, vector<128x128xf32>
    %cst_27 = arith.constant dense<0.000000e+00> : vector<1x128xf32>
    %48 = tpu.matmul %42, %47, %cst_27 {dimension_numbers = #tpu.dot_dimension_numbers<[1], [0], [0], [1], [0, 0, 1, 1], [], []>} : vector<1x128xf32>, vector<128x128xf32>, vector<1x128xf32> -> vector<1x128xf32>
    %49 = arith.addf %46, %48 : vector<1x128xf32>
    %c7_i32 = arith.constant 7 : i32
    %c7 = arith.constant 7 : index
    %50 = memref.load %arg1[%c7] : memref<8xi32, #tpu.memory_space<smem>>
    %51 = arith.index_cast %50 : i32 to index
    %c0_28 = arith.constant 0 : index
    %52 = vector.load %arg4[%51, %c0_28] : memref<57x128xf32, #tpu.memory_space<vmem>>, vector<1x128xf32>
    %c0_29 = arith.constant 0 : index
    %c0_30 = arith.constant 0 : index
    %53 = vector.load %arg5[%c0_29, %c0_30] : memref<128x128xf32, #tpu.memory_space<vmem>>, vector<128x128xf32>
    %cst_31 = arith.constant dense<0.000000e+00> : vector<1x128xf32>
    %54 = tpu.matmul %49, %53, %cst_31 {dimension_numbers = #tpu.dot_dimension_numbers<[1], [0], [0], [1], [0, 0, 1, 1], [], []>} : vector<1x128xf32>, vector<128x128xf32>, vector<1x128xf32> -> vector<1x128xf32>
    %55 = arith.addf %52, %54 : vector<1x128xf32>
    %c7_32 = arith.constant 7 : index
    %56 = memref.load %arg1[%c7_32] : memref<8xi32, #tpu.memory_space<smem>>
    %57 = arith.index_cast %56 : i32 to index
    %c0_33 = arith.constant 0 : index
    %58 = vector.load %arg2[%57, %c0_33] : memref<57x128xf32, #tpu.memory_space<vmem>>, vector<1x128xf32>
    %c0_34 = arith.constant 0 : index
    %c0_35 = arith.constant 0 : index
    %59 = vector.load %arg3[%c0_34, %c0_35] : memref<128x128xf32, #tpu.memory_space<vmem>>, vector<128x128xf32>
    %cst_36 = arith.constant dense<0.000000e+00> : vector<1x128xf32>
    %60 = tpu.matmul %49, %59, %cst_36 {dimension_numbers = #tpu.dot_dimension_numbers<[1], [0], [0], [1], [0, 0, 1, 1], [], []>} : vector<1x128xf32>, vector<128x128xf32>, vector<1x128xf32> -> vector<1x128xf32>
    %61 = arith.addf %58, %60 : vector<1x128xf32>
    %c0_37 = arith.constant 0 : index
    %c0_38 = arith.constant 0 : index
    %62 = vector.load %arg8[%c0_37, %c0_38] : memref<1x128xf32, #tpu.memory_space<vmem>>, vector<1x128xf32>
    tpu.vector_store %arg8[%c0_37, %c0_38], %61 {strides = array<i32>} : memref<1x128xf32, #tpu.memory_space<vmem>>, vector<1x128xf32>,
    %63 = tpu.iota {dimensions = array<i32: 1>} : vector<1x128xi32>
    %c18_i32 = arith.constant 18 : i32
    %64 = vector.broadcast %c18_i32 : i32 to vector<1x128xi32>
    %65 = arith.cmpi slt, %63, %64 : vector<1x128xi32>
    %cst_39 = arith.constant -1.000000e+30 : f32
    %66 = vector.broadcast %cst_39 : f32 to vector<1x128xf32>
    %67 = arith.select %65, %55, %66 : vector<1x128xi1>, vector<1x128xf32>
    %cst_40 = arith.constant dense<0xFF800000> : vector<1xf32>
    %68 = vector.multi_reduction <maximumf>, %67, %cst_40 [1] : vector<1x128xf32> to vector<1xf32>
    %69 = vector.shape_cast %68 : vector<1xf32> to vector<1x1xf32>
    %70 = vector.broadcast %69 : vector<1x1xf32> to vector<1x128xf32>
    %71 = arith.subf %67, %70 : vector<1x128xf32>
    %72 = math.exp %71 : vector<1x128xf32>
    %cst_41 = arith.constant dense<0.000000e+00> : vector<1xf32>
    %73 = vector.multi_reduction <add>, %72, %cst_41 [1] : vector<1x128xf32> to vector<1xf32>
    %74 = vector.shape_cast %73 : vector<1xf32> to vector<1x1xf32>
    %75 = math.log %74 : vector<1x1xf32>
    %76 = vector.broadcast %75 : vector<1x1xf32> to vector<1x128xf32>
    %77 = arith.subf %71, %76 : vector<1x128xf32>
    %c0_42 = arith.constant 0 : index
    %c0_43 = arith.constant 0 : index
    %78 = vector.load %arg7[%c0_42, %c0_43] : memref<1x128xf32, #tpu.memory_space<vmem>>, vector<1x128xf32>
    tpu.vector_store %arg7[%c0_42, %c0_43], %77 {strides = array<i32>} : memref<1x128xf32, #tpu.memory_space<vmem>>, vector<1x128xf32>,
    return
  }
  func.func @transform_0(%arg0: i32, %arg1: memref<8xi32, #tpu.memory_space<smem>>) -> (i32, i32) {
    %c0_i32 = arith.constant 0 : i32
    %c0_i32_0 = arith.constant 0 : i32
    %c0_i32_1 = arith.constant 0 : i32
    return %c0_i32, %c0_i32_0 : i32, i32
  }
  func.func @transform_1(%arg0: i32, %arg1: memref<8xi32, #tpu.memory_space<smem>>) -> (i32, i32) {
    %c0_i32 = arith.constant 0 : i32
    %c0_i32_0 = arith.constant 0 : i32
    %c0_i32_1 = arith.constant 0 : i32
    return %c0_i32, %c0_i32_0 : i32, i32
  }
  func.func @transform_2(%arg0: i32, %arg1: memref<8xi32, #tpu.memory_space<smem>>) -> (i32, i32) {
    %c0_i32 = arith.constant 0 : i32
    %c0_i32_0 = arith.constant 0 : i32
    %c0_i32_1 = arith.constant 0 : i32
    return %c0_i32, %c0_i32_0 : i32, i32
  }
  func.func @transform_3(%arg0: i32, %arg1: memref<8xi32, #tpu.memory_space<smem>>) -> (i32, i32) {
    %c0_i32 = arith.constant 0 : i32
    %c0_i32_0 = arith.constant 0 : i32
    %c0_i32_1 = arith.constant 0 : i32
    return %c0_i32, %c0_i32_0 : i32, i32
  }
  func.func @transform_4(%arg0: i32, %arg1: memref<8xi32, #tpu.memory_space<smem>>) -> (i32, i32) {
    %c0_i32 = arith.constant 0 : i32
    %c0_i32_0 = arith.constant 0 : i32
    %c0_i32_1 = arith.constant 0 : i32
    return %c0_i32, %c0_i32_0 : i32, i32
  }
  func.func @transform_5(%arg0: i32, %arg1: memref<8xi32, #tpu.memory_space<smem>>) -> (i32, i32) {
    %c0_i32 = arith.constant 0 : i32
    %c0_i32_0 = arith.constant 0 : i32
    %c0_i32_1 = arith.constant 0 : i32
    return %c0_i32, %c0_i32_0 : i32, i32
  }
  func.func @transform_6(%arg0: i32, %arg1: memref<8xi32, #tpu.memory_space<smem>>) -> (i32, i32) {
    %c0_i32 = arith.constant 0 : i32
    %c0_i32_0 = arith.constant 0 : i32
    %c0_i32_1 = arith.constant 0 : i32
    return %c0_i32, %c0_i32_0 : i32, i32
  }
}

</mosaic_0001>

<bundles_post_ra>
// kernel: rnn_forward_sequence.1
= control target key start
LH: loop header
LB: loop body
LE: loop exit
PB: predicated region body
PF: predicated region fallthrough
CT: control target
= control target key end

     0   :  { %s1829_s0 = inlined_call_operand.vmem [shape: s32[8], index: 0, kind: input, shape index: {}]   ;;  %s1830_s1 = inlined_call_operand.vmem [shape: f32[57,128], index: 1, kind: input, shape index: {}]   ;;  %s1831_s2 = inlined_call_operand.vmem [shape: f32[128,128], index: 2, kind: input, shape index: {}]   ;;  %s1832_s3 = inlined_call_operand.vmem [shape: f32[57,128], index: 3, kind: input, shape index: {}]   ;;  %s1833_s4 = inlined_call_operand.vmem [shape: f32[128,128], index: 4, kind: input, shape index: {}]   ;;  %s1834_s5 = inlined_call_operand.vmem [shape: f32[1,128], index: 5, kind: input, shape index: {}]   ;;  %s1835_s6 = inlined_call_operand.hbm [shape: f32[1,128], index: 6, kind: output, shape index: {0}]   ;;  %s1836_s7 = inlined_call_operand.hbm [shape: f32[1,128], index: 7, kind: output, shape index: {1}]  }
   0x1   :  { %s13_s26 = sshll.u32 %s1829_s0, 4  ;;  %s14_s26 = int_to_ptr.vmem [resolvable:$true] %s13_s26 }
   0x2   :  { %s1269_s27 = scalar_lea.vmem %s14_s26, 16  ;;  %p1274_p1 = scmp.lt.s32.totalorder %s14_s26, %s14_s26 }
   0x3   :  { %p1270_p0 = scmp.ne.s32.totalorder %s14_s26, %s1269_s27  ;;  %p1275_p2 = scmp.lt.s32.totalorder %s1269_s27, %s1269_s27 }
   0x5   :  { %p1276_p3 = por %p1275_p2, %p1274_p1 }
   0x7   :  { %p1277_p4 = pnand %p1276_p3, %p1270_p0 }
   0x9   :  { %1280 = shalt.err (!%p1277_p4)  }
   0xa   :  { %s1327_s28 = smov [#allocation3]  }
   0xb   :  { %16 = dma.vmem_to_smem %s14_s26, 16, %s1327_s28, [#allocation2] }
   0xc   :  { %1321 = dma.done.wait [#allocation2], 16 }
   0xd   :  { %1322 = vsyncadd [#allocation2], 4294967280 }
   0xe   :  { %18 = sfence }
   0xf   :  { %19 = vsyncpa [#allocation5], 0  ;;  %v1378_v0 = vld [vmem:[%s1831_s2 + $0x78] sm:$0xff]  ;;  %v1328_v1 = vmov 0.0   ;;  %v1384_v2 = vld [vmem:[%s1831_s2 + $0x70] sm:$0xff]  ;;  %vm1329_vm0 = vmmov 0  }
  0x10   :  { %945 = vmatprep.subr.mxu0 %v1328_v1  ;;  %977 = vmatprep.mubr.msk.f32.mxu0 %vm1329_vm0, %v1328_v1  ;;  %v1394_v3 = vld [vmem:[%s1831_s2 + $0x68] sm:$0xff]  ;;  %v1403_v4 = vld [vmem:[%s1831_s2 + $0x60] sm:$0xff] }
  0x11   :  { %946 = vmatpush3.msra.mxu0 %v1378_v0  ;;  %980 = vmatprep.subr.mxu1 %v1328_v1 }
  0x12   :  { %947 = vmatprep.subr.mxu0 %v1328_v1  ;;  %981 = vmatpush3.msra.mxu1 %v1378_v0 }
  0x13   :  { %948 = vmatpush3.msra.mxu0 %v1384_v2  ;;  %982 = vmatprep.subr.mxu1 %v1328_v1 }
  0x14   :  { %949 = vmatprep.subr.mxu0 %v1328_v1  ;;  %983 = vmatpush3.msra.mxu1 %v1384_v2 }
  0x15   :  { %20 = vsyncpa [#allocation7], 0  ;;  %950 = vmatpush3.msra.mxu0 %v1394_v3  ;;  %984 = vmatprep.subr.mxu1 %v1328_v1  ;;  %v1412_v5 = vld [vmem:[%s1831_s2 + $0x58] sm:$0xff]  ;;  %v1421_v6 = vld [vmem:[%s1831_s2 + $0x50] sm:$0xff]  ;;  %s785_s17 = sld [smem:[#allocation3 + $0x1]]  ;;  %v730_v62 = vlaneseq  ;;  %vm734_vm2 = vcmask 1040384  }
  0x16   :  { %951 = vmatprep.subr.mxu0 %v1328_v1  ;;  %985 = vmatpush3.msra.mxu1 %v1394_v3  ;;  %v1430_v7 = vld [vmem:[%s1831_s2 + $0x48] sm:$0xff]  ;;  %v1439_v8 = vld [vmem:[%s1831_s2 + $0x40] sm:$0xff]  ;;  %v1448_v9 = vld [vmem:[%s1831_s2 + $0x38] sm:$0xff]  ;;  %s786_s21 = sld [smem:[#allocation3 + $0x2]] }
  0x17   :  { %952 = vmatpush3.msra.mxu0 %v1403_v4  ;;  %986 = vmatprep.subr.mxu1 %v1328_v1  ;;  %v1457_v10 = vld [vmem:[%s1831_s2 + $0x30] sm:$0xff]  ;;  %v1466_v11 = vld [vmem:[%s1831_s2 + $0x28] sm:$0xff]  ;;  %v1475_v12 = vld [vmem:[%s1831_s2 + $0x20] sm:$0xff]  ;;  %s787_s25 = sld [smem:[#allocation3 + $0x3]]  ;;  %v731_v63 = vand.u32 127, %v730_v62 }
  0x18   :  { %953 = vmatprep.subr.mxu0 %v1328_v1  ;;  %987 = vmatpush3.msra.mxu1 %v1403_v4  ;;  %v1484_v13 = vld [vmem:[%s1831_s2 + $0x18] sm:$0xff]  ;;  %v1493_v14 = vld [vmem:[%s1831_s2 + $0x10] sm:$0xff]  ;;  %v1502_v15 = vld [vmem:[%s1831_s2 + $0x8] sm:$0xff]  ;;  %s788_s29 = sld [smem:[#allocation3 + $0x4]] }
  0x19   :  { %954 = vmatpush3.msra.mxu0 %v1412_v5  ;;  %988 = vmatprep.subr.mxu1 %v1328_v1  ;;  %v1511_v16 = vld [vmem:[%s1831_s2] sm:$0xff]  ;;  %s32_s2 = sld [smem:[#allocation3]]  ;;  %v584_v38 = vld [vmem:[%s1833_s4 + $0x78] sm:$0xff]  ;;  %v583_v39 = vld [vmem:[%s1833_s4 + $0x70] sm:$0xff]  ;;  %vm732_vm1 = vcmp.lt.s32.totalorder %v731_v63, 18 }
  0x1a   :  { %955 = vmatprep.subr.mxu0 %v1328_v1  ;;  %989 = vmatpush3.msra.mxu1 %v1412_v5  ;;  %v31_v17 = vld [vmem:[%s1834_s5] sm:$0x1]  ;;  %v582_v40 = vld [vmem:[%s1833_s4 + $0x68] sm:$0xff]  ;;  %v580_v42 = vld [vmem:[%s1833_s4 + $0x58] sm:$0xff]  ;;  %s789_s11 = sld [smem:[#allocation3 + $0x5]] }
  0x1b   :  { %956 = vmatpush3.msra.mxu0 %v1421_v6  ;;  %990 = vmatprep.subr.mxu1 %v1328_v1  ;;  %s123_s20 = scalar_lea.vmem %s1830_s1, %s785_s17  ;;  %v581_v41 = vld [vmem:[%s1833_s4 + $0x60] sm:$0xff]  ;;  %v579_v43 = vld [vmem:[%s1833_s4 + $0x50] sm:$0xff]  ;;  %v578_v44 = vld [vmem:[%s1833_s4 + $0x48] sm:$0xff]  ;;  %s790_s17 = sld [smem:[#allocation3 + $0x6]] }
  0x1c   :  { %957 = vmatprep.subr.mxu0 %v1328_v1  ;;  %991 = vmatpush3.msra.mxu1 %v1421_v6  ;;  %v124_v22 = vld [vmem:[%s123_s20] sm:$0x1]  ;;  %s197_s24 = scalar_lea.vmem %s1830_s1, %s786_s21  ;;  %v576_v46 = vld [vmem:[%s1833_s4 + $0x38] sm:$0xff]  ;;  %v575_v47 = vld [vmem:[%s1833_s4 + $0x30] sm:$0xff]  ;;  %s791_s21 = sld [smem:[#allocation3 + $0x7]] }
  0x1d   :  { %958 = vmatpush3.msra.mxu0 %v1430_v7  ;;  %992 = vmatprep.subr.mxu1 %v1328_v1  ;;  %v198_v26 = vld [vmem:[%s197_s24] sm:$0x1]  ;;  %s271_s28 = scalar_lea.vmem %s1830_s1, %s787_s25  ;;  %v574_v48 = vld [vmem:[%s1833_s4 + $0x28] sm:$0xff]  ;;  %v572_v50 = vld [vmem:[%s1833_s4 + $0x18] sm:$0xff] }
  0x1e   :  { %959 = vmatprep.subr.mxu0 %v1328_v1  ;;  %993 = vmatpush3.msra.mxu1 %v1430_v7  ;;  %v272_v30 = vld [vmem:[%s271_s28] sm:$0x1]  ;;  %s345_s8 = scalar_lea.vmem %s1830_s1, %s788_s29  ;;  %v571_v51 = vld [vmem:[%s1833_s4 + $0x10] sm:$0xff]  ;;  %v570_v56 = vld [vmem:[%s1833_s4 + $0x8] sm:$0xff] }
  0x1f   :  { %960 = vmatpush3.msra.mxu0 %v1439_v8  ;;  %994 = vmatprep.subr.mxu1 %v1328_v1  ;;  %s33_s16 = scalar_lea.vmem %s1830_s1, %s32_s2  ;;  %v346_v34 = vld [vmem:[%s345_s8] sm:$0x1] }
  0x20   :  { %961 = vmatprep.subr.mxu0 %v1328_v1  ;;  %995 = vmatpush3.msra.mxu1 %v1439_v8  ;;  %v34_v18 = vld [vmem:[%s33_s16] sm:$0x1]  ;;  %s419_s14 = scalar_lea.vmem %s1830_s1, %s789_s11 }
  0x21   :  { %962 = vmatpush3.msra.mxu0 %v1448_v9  ;;  %996 = vmatprep.subr.mxu1 %v1328_v1  ;;  %v577_v45 = vld [vmem:[%s1833_s4 + $0x40] sm:$0xff]  ;;  %s493_s20 = scalar_lea.vmem %s1830_s1, %s790_s17 }
  0x22   :  { %963 = vmatprep.subr.mxu0 %v1328_v1  ;;  %997 = vmatpush3.msra.mxu1 %v1448_v9  ;;  %v573_v49 = vld [vmem:[%s1833_s4 + $0x20] sm:$0xff]  ;;  %s567_s24 = scalar_lea.vmem %s1832_s3, %s791_s21  ;;  %s656_s26 = scalar_lea.vmem %s1830_s1, %s791_s21 }
  0x23   :  { %964 = vmatpush3.msra.mxu0 %v1457_v10  ;;  %998 = vmatprep.subr.mxu1 %v1328_v1  ;;  %v420_v52 = vld [vmem:[%s419_s14] sm:$0x1]  ;;  %s1330_s1 = smov [#allocation6]  }
  0x24   :  { %965 = vmatprep.subr.mxu0 %v1328_v1  ;;  %999 = vmatpush3.msra.mxu1 %v1457_v10  ;;  %v569_v57 = vld [vmem:[%s1833_s4] sm:$0xff]  ;;  %s764_s3 = sshll.u32 %s1330_s1, 4  ;;  %s765_s3 = int_to_ptr.vmem [resolvable:$true] %s764_s3 }
  0x25   :  { %966 = vmatpush3.msra.mxu0 %v1466_v11  ;;  %1000 = vmatprep.subr.mxu1 %v1328_v1  ;;  %v494_v58 = vld [vmem:[%s493_s20] sm:$0x1]  ;;  %s1281_s27 = scalar_lea.vmem %s765_s3, 16  ;;  %s1285_s28 = scalar_lea.vmem %s765_s3, 32 }
  0x26   :  { %967 = vmatprep.subr.mxu0 %v1328_v1  ;;  %1001 = vmatpush3.msra.mxu1 %v1466_v11  ;;  %p1282_p5 = scmp.ne.s32.totalorder %s765_s3, %s1281_s27  ;;  %p1286_p6 = scmp.lt.s32.totalorder %s765_s3, %s765_s3 }
  0x27   :  { %968 = vmatpush3.msra.mxu0 %v1475_v12  ;;  %1002 = vmatprep.subr.mxu1 %v1328_v1  ;;  %p1287_p7 = scmp.lt.s32.totalorder %s1285_s28, %s1281_s27 }
  0x28   :  { %969 = vmatprep.subr.mxu0 %v1328_v1  ;;  %1003 = vmatpush3.msra.mxu1 %v1475_v12 }
  0x29   :  { %970 = vmatpush3.msra.mxu0 %v1484_v13  ;;  %1004 = vmatprep.subr.mxu1 %v1328_v1  ;;  %p1288_p8 = por %p1287_p7, %p1286_p6 }
  0x2a   :  { %971 = vmatprep.subr.mxu0 %v1328_v1  ;;  %1005 = vmatpush3.msra.mxu1 %v1484_v13 }
  0x2b   :  { %972 = vmatpush3.msra.mxu0 %v1493_v14  ;;  %1006 = vmatprep.subr.mxu1 %v1328_v1  ;;  %p1289_p9 = pnand %p1288_p8, %p1282_p5 }
  0x2c   :  { %973 = vmatprep.subr.mxu0 %v1328_v1  ;;  %1007 = vmatpush3.msra.mxu1 %v1493_v14 }
  0x2d   :  { %974 = vmatpush3.msra.mxu0 %v1502_v15  ;;  %1008 = vmatprep.subr.mxu1 %v1328_v1 }
  0x2e   :  { %975 = vmatprep.subr.mxu0 %v1328_v1  ;;  %1009 = vmatpush3.msra.mxu1 %v1502_v15 }
  0x2f   :  { %976 = vmatpush3.msra.mxu0 %v1511_v16  ;;  %1010 = vmatprep.subr.mxu1 %v1328_v1 }
  0x30   :  { %978 = vmatmul.mubr.f32.vlgmr.msra.gmra.mxu0 %v31_v17  ;;  %1011 = vmatpush3.msra.mxu1 %v1511_v16 }
  0x31   :  { %1012 = vmatprep.mubr.msk.f32.mxu1 %vm1329_vm0, %v1328_v1  ;;  %1015 = vmatprep.subr.mxu0 %v1328_v1 }
  0x32   :  { %1016 = vmatpush3.msra.mxu0 %v1378_v0  ;;  %1047 = vmatprep.mubr.msk.f32.mxu0 %vm1329_vm0, %v1328_v1 }
  0x33   :  { %1017 = vmatprep.subr.mxu0 %v1328_v1  ;;  %1050 = vmatprep.subr.mxu1 %v1328_v1 }
  0x34   :  { %1018 = vmatpush3.msra.mxu0 %v1384_v2 }
  0x35   :  { %1019 = vmatprep.subr.mxu0 %v1328_v1 }
  0x36   :  { %1020 = vmatpush3.msra.mxu0 %v1394_v3 }
  0x37   :  { %1021 = vmatprep.subr.mxu0 %v1328_v1 }
  0x38   :  { %1022 = vmatpush3.msra.mxu0 %v1403_v4 }
  0x39   :  { %1023 = vmatprep.subr.mxu0 %v1328_v1 }
  0x3a   :  { %1024 = vmatpush3.msra.mxu0 %v1412_v5 }
  0x3b   :  { %1025 = vmatprep.subr.mxu0 %v1328_v1 }
  0x3c   :  { %1026 = vmatpush3.msra.mxu0 %v1421_v6 }
  0x3d   :  { %1027 = vmatprep.subr.mxu0 %v1328_v1 }
  0x3e   :  { %1028 = vmatpush3.msra.mxu0 %v1430_v7 }
  0x3f   :  { %1029 = vmatprep.subr.mxu0 %v1328_v1 }
  0x40   :  { %1030 = vmatpush3.msra.mxu0 %v1439_v8 }
  0x41   :  { %1031 = vmatprep.subr.mxu0 %v1328_v1 }
  0x42   :  { %1032 = vmatpush3.msra.mxu0 %v1448_v9 }
  0x43   :  { %1033 = vmatprep.subr.mxu0 %v1328_v1 }
  0x44   :  { %1034 = vmatpush3.msra.mxu0 %v1457_v10 }
  0x45   :  { %1035 = vmatprep.subr.mxu0 %v1328_v1 }
  0x46   :  { %1036 = vmatpush3.msra.mxu0 %v1466_v11 }
  0x47   :  { %1037 = vmatprep.subr.mxu0 %v1328_v1 }
  0x48   :  { %1038 = vmatpush3.msra.mxu0 %v1475_v12 }
  0x49   :  { %1039 = vmatprep.subr.mxu0 %v1328_v1 }
  0x4a   :  { %1040 = vmatpush3.msra.mxu0 %v1484_v13 }
  0x4b   :  { %1041 = vmatprep.subr.mxu0 %v1328_v1 }
  0x4c   :  { %1042 = vmatpush3.msra.mxu0 %v1493_v14 }
  0x4d   :  { %1043 = vmatprep.subr.mxu0 %v1328_v1 }
  0x4e   :  { %1044 = vmatpush3.msra.mxu0 %v1502_v15 }
  0x4f   :  { %1045 = vmatprep.subr.mxu0 %v1328_v1 }
  0x50   :  { %1046 = vmatpush3.msra.mxu0 %v1511_v16 }
  0x51   :  { %1085 = vmatprep.subr.mxu0 %v1328_v1 }
  0xf0   :  { %v117_v19 = vpop.f32.mrf.mxu0 }
  0xf1   :  { %v121_v20 = vadd.f32 %v117_v19, %v34_v18 }
  0xf2   :  { %v979_v21 = vpop.f32.mrf.mxu0 }
  0xf3   :  { %1013 = vmatmul.mubr.f32.vlgmr.msra.gmra.mxu1 %v121_v20 }
  0xf4   :  { %1051 = vmatpush3.msra.mxu1 %v1378_v0  ;;  %1082 = vmatprep.mubr.msk.f32.mxu1 %vm1329_vm0, %v1328_v1 }
  0xf5   :  { %1052 = vmatprep.subr.mxu1 %v1328_v1 }
  0xf6   :  { %1053 = vmatpush3.msra.mxu1 %v1384_v2 }
  0xf7   :  { %1054 = vmatprep.subr.mxu1 %v1328_v1 }
  0xf8   :  { %1055 = vmatpush3.msra.mxu1 %v1394_v3 }
  0xf9   :  { %1056 = vmatprep.subr.mxu1 %v1328_v1 }
  0xfa   :  { %1057 = vmatpush3.msra.mxu1 %v1403_v4 }
  0xfb   :  { %1058 = vmatprep.subr.mxu1 %v1328_v1 }
  0xfc   :  { %1059 = vmatpush3.msra.mxu1 %v1412_v5 }
  0xfd   :  { %1060 = vmatprep.subr.mxu1 %v1328_v1 }
  0xfe   :  { %1061 = vmatpush3.msra.mxu1 %v1421_v6 }
  0xff   :  { %1062 = vmatprep.subr.mxu1 %v1328_v1 }
 0x100   :  { %1063 = vmatpush3.msra.mxu1 %v1430_v7 }
 0x101   :  { %1064 = vmatprep.subr.mxu1 %v1328_v1 }
 0x102   :  { %1065 = vmatpush3.msra.mxu1 %v1439_v8 }
 0x103   :  { %1066 = vmatprep.subr.mxu1 %v1328_v1 }
 0x104   :  { %1067 = vmatpush3.msra.mxu1 %v1448_v9 }
 0x105   :  { %1068 = vmatprep.subr.mxu1 %v1328_v1 }
 0x106   :  { %1069 = vmatpush3.msra.mxu1 %v1457_v10 }
 0x107   :  { %1070 = vmatprep.subr.mxu1 %v1328_v1 }
 0x108   :  { %1071 = vmatpush3.msra.mxu1 %v1466_v11 }
 0x109   :  { %1072 = vmatprep.subr.mxu1 %v1328_v1 }
 0x10a   :  { %1073 = vmatpush3.msra.mxu1 %v1475_v12 }
 0x10b   :  { %1074 = vmatprep.subr.mxu1 %v1328_v1 }
 0x10c   :  { %1075 = vmatpush3.msra.mxu1 %v1484_v13 }
 0x10d   :  { %1076 = vmatprep.subr.mxu1 %v1328_v1 }
 0x10e   :  { %1077 = vmatpush3.msra.mxu1 %v1493_v14 }
 0x10f   :  { %1078 = vmatprep.subr.mxu1 %v1328_v1 }
 0x110   :  { %1079 = vmatpush3.msra.mxu1 %v1502_v15 }
 0x111   :  { %1080 = vmatprep.subr.mxu1 %v1328_v1 }
 0x112   :  { %1081 = vmatpush3.msra.mxu1 %v1511_v16 }
 0x113   :  { %1120 = vmatprep.subr.mxu1 %v1328_v1 }
 0x1b3   :  { %v191_v23 = vpop.f32.mrf.mxu1 }
 0x1b4   :  { %v195_v24 = vadd.f32 %v191_v23, %v124_v22 }
 0x1b5   :  { %v1014_v25 = vpop.f32.mrf.mxu1 }
 0x1b6   :  { %1048 = vmatmul.mubr.f32.vlgmr.msra.gmra.mxu0 %v195_v24 }
 0x1b7   :  { %1086 = vmatpush3.msra.mxu0 %v1378_v0  ;;  %1117 = vmatprep.mubr.msk.f32.mxu0 %vm1329_vm0, %v1328_v1 }
 0x1b8   :  { %1087 = vmatprep.subr.mxu0 %v1328_v1 }
 0x1b9   :  { %1088 = vmatpush3.msra.mxu0 %v1384_v2 }
 0x1ba   :  { %1089 = vmatprep.subr.mxu0 %v1328_v1 }
 0x1bb   :  { %1090 = vmatpush3.msra.mxu0 %v1394_v3 }
 0x1bc   :  { %1091 = vmatprep.subr.mxu0 %v1328_v1 }
 0x1bd   :  { %1092 = vmatpush3.msra.mxu0 %v1403_v4 }
 0x1be   :  { %1093 = vmatprep.subr.mxu0 %v1328_v1 }
 0x1bf   :  { %1094 = vmatpush3.msra.mxu0 %v1412_v5 }
 0x1c0   :  { %1095 = vmatprep.subr.mxu0 %v1328_v1 }
 0x1c1   :  { %1096 = vmatpush3.msra.mxu0 %v1421_v6 }
 0x1c2   :  { %1097 = vmatprep.subr.mxu0 %v1328_v1 }
 0x1c3   :  { %1098 = vmatpush3.msra.mxu0 %v1430_v7 }
 0x1c4   :  { %1099 = vmatprep.subr.mxu0 %v1328_v1 }
 0x1c5   :  { %1100 = vmatpush3.msra.mxu0 %v1439_v8 }
 0x1c6   :  { %1101 = vmatprep.subr.mxu0 %v1328_v1 }
 0x1c7   :  { %1102 = vmatpush3.msra.mxu0 %v1448_v9 }
 0x1c8   :  { %1103 = vmatprep.subr.mxu0 %v1328_v1 }
 0x1c9   :  { %1104 = vmatpush3.msra.mxu0 %v1457_v10 }
 0x1ca   :  { %1105 = vmatprep.subr.mxu0 %v1328_v1 }
 0x1cb   :  { %1106 = vmatpush3.msra.mxu0 %v1466_v11 }
 0x1cc   :  { %1107 = vmatprep.subr.mxu0 %v1328_v1 }
 0x1cd   :  { %1108 = vmatpush3.msra.mxu0 %v1475_v12 }
 0x1ce   :  { %1109 = vmatprep.subr.mxu0 %v1328_v1 }
 0x1cf   :  { %1110 = vmatpush3.msra.mxu0 %v1484_v13 }
 0x1d0   :  { %1111 = vmatprep.subr.mxu0 %v1328_v1 }
 0x1d1   :  { %1112 = vmatpush3.msra.mxu0 %v1493_v14 }
 0x1d2   :  { %1113 = vmatprep.subr.mxu0 %v1328_v1 }
 0x1d3   :  { %1114 = vmatpush3.msra.mxu0 %v1502_v15 }
 0x1d4   :  { %1115 = vmatprep.subr.mxu0 %v1328_v1 }
 0x1d5   :  { %1116 = vmatpush3.msra.mxu0 %v1511_v16 }
 0x1d6   :  { %1155 = vmatprep.subr.mxu0 %v1328_v1 }
 0x276   :  { %v265_v27 = vpop.f32.mrf.mxu0 }
 0x277   :  { %v269_v28 = vadd.f32 %v265_v27, %v198_v26 }
 0x278   :  { %v1049_v29 = vpop.f32.mrf.mxu0 }
 0x279   :  { %1083 = vmatmul.mubr.f32.vlgmr.msra.gmra.mxu1 %v269_v28 }
 0x27a   :  { %1121 = vmatpush3.msra.mxu1 %v1378_v0  ;;  %1152 = vmatprep.mubr.msk.f32.mxu1 %vm1329_vm0, %v1328_v1 }
 0x27b   :  { %1122 = vmatprep.subr.mxu1 %v1328_v1 }
 0x27c   :  { %1123 = vmatpush3.msra.mxu1 %v1384_v2 }
 0x27d   :  { %1124 = vmatprep.subr.mxu1 %v1328_v1 }
 0x27e   :  { %1125 = vmatpush3.msra.mxu1 %v1394_v3 }
 0x27f   :  { %1126 = vmatprep.subr.mxu1 %v1328_v1 }
 0x280   :  { %1127 = vmatpush3.msra.mxu1 %v1403_v4 }
 0x281   :  { %1128 = vmatprep.subr.mxu1 %v1328_v1 }
 0x282   :  { %1129 = vmatpush3.msra.mxu1 %v1412_v5 }
 0x283   :  { %1130 = vmatprep.subr.mxu1 %v1328_v1 }
 0x284   :  { %1131 = vmatpush3.msra.mxu1 %v1421_v6 }
 0x285   :  { %1132 = vmatprep.subr.mxu1 %v1328_v1 }
 0x286   :  { %1133 = vmatpush3.msra.mxu1 %v1430_v7 }
 0x287   :  { %1134 = vmatprep.subr.mxu1 %v1328_v1 }
 0x288   :  { %1135 = vmatpush3.msra.mxu1 %v1439_v8 }
 0x289   :  { %1136 = vmatprep.subr.mxu1 %v1328_v1 }
 0x28a   :  { %1137 = vmatpush3.msra.mxu1 %v1448_v9 }
 0x28b   :  { %1138 = vmatprep.subr.mxu1 %v1328_v1 }
 0x28c   :  { %1139 = vmatpush3.msra.mxu1 %v1457_v10 }
 0x28d   :  { %1140 = vmatprep.subr.mxu1 %v1328_v1 }
 0x28e   :  { %1141 = vmatpush3.msra.mxu1 %v1466_v11 }
 0x28f   :  { %1142 = vmatprep.subr.mxu1 %v1328_v1 }
 0x290   :  { %1143 = vmatpush3.msra.mxu1 %v1475_v12 }
 0x291   :  { %1144 = vmatprep.subr.mxu1 %v1328_v1 }
 0x292   :  { %1145 = vmatpush3.msra.mxu1 %v1484_v13 }
 0x293   :  { %1146 = vmatprep.subr.mxu1 %v1328_v1 }
 0x294   :  { %1147 = vmatpush3.msra.mxu1 %v1493_v14 }
 0x295   :  { %1148 = vmatprep.subr.mxu1 %v1328_v1 }
 0x296   :  { %1149 = vmatpush3.msra.mxu1 %v1502_v15 }
 0x297   :  { %1150 = vmatprep.subr.mxu1 %v1328_v1 }
 0x298   :  { %1151 = vmatpush3.msra.mxu1 %v1511_v16 }
 0x299   :  { %1190 = vmatprep.subr.mxu1 %v1328_v1 }
 0x339   :  { %v339_v31 = vpop.f32.mrf.mxu1 }
 0x33a   :  { %v343_v32 = vadd.f32 %v339_v31, %v272_v30 }
 0x33b   :  { %v1084_v33 = vpop.f32.mrf.mxu1 }
 0x33c   :  { %1118 = vmatmul.mubr.f32.vlgmr.msra.gmra.mxu0 %v343_v32 }
 0x33d   :  { %1156 = vmatpush3.msra.mxu0 %v1378_v0  ;;  %1187 = vmatprep.mubr.msk.f32.mxu0 %vm1329_vm0, %v1328_v1 }
 0x33e   :  { %1157 = vmatprep.subr.mxu0 %v1328_v1 }
 0x33f   :  { %1158 = vmatpush3.msra.mxu0 %v1384_v2 }
 0x340   :  { %1159 = vmatprep.subr.mxu0 %v1328_v1 }
 0x341   :  { %1160 = vmatpush3.msra.mxu0 %v1394_v3 }
 0x342   :  { %1161 = vmatprep.subr.mxu0 %v1328_v1 }
 0x343   :  { %1162 = vmatpush3.msra.mxu0 %v1403_v4 }
 0x344   :  { %1163 = vmatprep.subr.mxu0 %v1328_v1 }
 0x345   :  { %1164 = vmatpush3.msra.mxu0 %v1412_v5 }
 0x346   :  { %1165 = vmatprep.subr.mxu0 %v1328_v1 }
 0x347   :  { %1166 = vmatpush3.msra.mxu0 %v1421_v6 }
 0x348   :  { %1167 = vmatprep.subr.mxu0 %v1328_v1 }
 0x349   :  { %1168 = vmatpush3.msra.mxu0 %v1430_v7 }
 0x34a   :  { %1169 = vmatprep.subr.mxu0 %v1328_v1 }
 0x34b   :  { %1170 = vmatpush3.msra.mxu0 %v1439_v8 }
 0x34c   :  { %1171 = vmatprep.subr.mxu0 %v1328_v1 }
 0x34d   :  { %1172 = vmatpush3.msra.mxu0 %v1448_v9 }
 0x34e   :  { %1173 = vmatprep.subr.mxu0 %v1328_v1 }
 0x34f   :  { %1174 = vmatpush3.msra.mxu0 %v1457_v10 }
 0x350   :  { %1175 = vmatprep.subr.mxu0 %v1328_v1 }
 0x351   :  { %1176 = vmatpush3.msra.mxu0 %v1466_v11 }
 0x352   :  { %1177 = vmatprep.subr.mxu0 %v1328_v1 }
 0x353   :  { %1178 = vmatpush3.msra.mxu0 %v1475_v12 }
 0x354   :  { %1179 = vmatprep.subr.mxu0 %v1328_v1 }
 0x355   :  { %1180 = vmatpush3.msra.mxu0 %v1484_v13 }
 0x356   :  { %1181 = vmatprep.subr.mxu0 %v1328_v1 }
 0x357   :  { %1182 = vmatpush3.msra.mxu0 %v1493_v14 }
 0x358   :  { %1183 = vmatprep.subr.mxu0 %v1328_v1 }
 0x359   :  { %1184 = vmatpush3.msra.mxu0 %v1502_v15 }
 0x35a   :  { %1185 = vmatprep.subr.mxu0 %v1328_v1 }
 0x35b   :  { %1186 = vmatpush3.msra.mxu0 %v1511_v16 }
 0x35c   :  { %1225 = vmatprep.subr.mxu0 %v1328_v1 }
 0x3fc   :  { %v413_v35 = vpop.f32.mrf.mxu0 }
 0x3fd   :  { %v417_v36 = vadd.f32 %v413_v35, %v346_v34 }
 0x3fe   :  { %v1119_v37 = vpop.f32.mrf.mxu0 }
 0x3ff   :  { %1153 = vmatmul.mubr.f32.vlgmr.msra.gmra.mxu1 %v417_v36 }
 0x400   :  { %1222 = vmatprep.mubr.msk.f32.mxu1 %vm1329_vm0, %v1328_v1  ;;  %1191 = vmatpush3.msra.mxu1 %v584_v38 }
 0x401   :  { %1192 = vmatprep.subr.mxu1 %v1328_v1 }
 0x402   :  { %1193 = vmatpush3.msra.mxu1 %v583_v39 }
 0x403   :  { %1194 = vmatprep.subr.mxu1 %v1328_v1 }
 0x404   :  { %1195 = vmatpush3.msra.mxu1 %v582_v40 }
 0x405   :  { %1196 = vmatprep.subr.mxu1 %v1328_v1 }
 0x406   :  { %1197 = vmatpush3.msra.mxu1 %v581_v41 }
 0x407   :  { %1198 = vmatprep.subr.mxu1 %v1328_v1 }
 0x408   :  { %1199 = vmatpush3.msra.mxu1 %v580_v42 }
 0x409   :  { %1200 = vmatprep.subr.mxu1 %v1328_v1 }
 0x40a   :  { %1201 = vmatpush3.msra.mxu1 %v579_v43 }
 0x40b   :  { %1202 = vmatprep.subr.mxu1 %v1328_v1 }
 0x40c   :  { %1203 = vmatpush3.msra.mxu1 %v578_v44 }
 0x40d   :  { %1204 = vmatprep.subr.mxu1 %v1328_v1 }
 0x40e   :  { %1205 = vmatpush3.msra.mxu1 %v577_v45 }
 0x40f   :  { %1206 = vmatprep.subr.mxu1 %v1328_v1 }
 0x410   :  { %1207 = vmatpush3.msra.mxu1 %v576_v46 }
 0x411   :  { %1208 = vmatprep.subr.mxu1 %v1328_v1 }
 0x412   :  { %1209 = vmatpush3.msra.mxu1 %v575_v47 }
 0x413   :  { %1210 = vmatprep.subr.mxu1 %v1328_v1 }
 0x414   :  { %1211 = vmatpush3.msra.mxu1 %v574_v48 }
 0x415   :  { %1212 = vmatprep.subr.mxu1 %v1328_v1 }
 0x416   :  { %1213 = vmatpush3.msra.mxu1 %v573_v49 }
 0x417   :  { %1214 = vmatprep.subr.mxu1 %v1328_v1 }
 0x418   :  { %1215 = vmatpush3.msra.mxu1 %v572_v50 }
 0x419   :  { %1216 = vmatprep.subr.mxu1 %v1328_v1 }
 0x41a   :  { %1217 = vmatpush3.msra.mxu1 %v571_v51 }
 0x41b   :  { %1218 = vmatprep.subr.mxu1 %v1328_v1 }
 0x41c   :  { %1219 = vmatpush3.msra.mxu1 %v570_v56 }
 0x41d   :  { %1220 = vmatprep.subr.mxu1 %v1328_v1 }
 0x41e   :  { %1221 = vmatpush3.msra.mxu1 %v569_v57 }
 0x4bf   :  { %v487_v53 = vpop.f32.mrf.mxu1 }
 0x4c0   :  { %v491_v54 = vadd.f32 %v487_v53, %v420_v52 }
 0x4c1   :  { %v1154_v55 = vpop.f32.mrf.mxu1 }
 0x4c2   :  { %1188 = vmatmul.mubr.f32.vlgmr.msra.gmra.mxu0 %v491_v54 }
 0x4c3   :  { %1226 = vmatpush3.msra.mxu0 %v1378_v0  ;;  %1257 = vmatprep.mubr.msk.f32.mxu0 %vm1329_vm0, %v1328_v1  ;;  %v568_v0 = vld [vmem:[%s567_s24] sm:$0x1] }
 0x4c4   :  { %1227 = vmatprep.subr.mxu0 %v1328_v1 }
 0x4c5   :  { %1228 = vmatpush3.msra.mxu0 %v1384_v2 }
 0x4c6   :  { %1229 = vmatprep.subr.mxu0 %v1328_v1 }
 0x4c7   :  { %1230 = vmatpush3.msra.mxu0 %v1394_v3 }
 0x4c8   :  { %1231 = vmatprep.subr.mxu0 %v1328_v1 }
 0x4c9   :  { %1232 = vmatpush3.msra.mxu0 %v1403_v4 }
 0x4ca   :  { %1233 = vmatprep.subr.mxu0 %v1328_v1 }
 0x4cb   :  { %1234 = vmatpush3.msra.mxu0 %v1412_v5 }
 0x4cc   :  { %1235 = vmatprep.subr.mxu0 %v1328_v1 }
 0x4cd   :  { %1236 = vmatpush3.msra.mxu0 %v1421_v6 }
 0x4ce   :  { %1237 = vmatprep.subr.mxu0 %v1328_v1 }
 0x4cf   :  { %1238 = vmatpush3.msra.mxu0 %v1430_v7 }
 0x4d0   :  { %1239 = vmatprep.subr.mxu0 %v1328_v1 }
 0x4d1   :  { %1240 = vmatpush3.msra.mxu0 %v1439_v8 }
 0x4d2   :  { %1241 = vmatprep.subr.mxu0 %v1328_v1 }
 0x4d3   :  { %1242 = vmatpush3.msra.mxu0 %v1448_v9 }
 0x4d4   :  { %1243 = vmatprep.subr.mxu0 %v1328_v1 }
 0x4d5   :  { %1244 = vmatpush3.msra.mxu0 %v1457_v10 }
 0x4d6   :  { %1245 = vmatprep.subr.mxu0 %v1328_v1 }
 0x4d7   :  { %1246 = vmatpush3.msra.mxu0 %v1466_v11 }
 0x4d8   :  { %1247 = vmatprep.subr.mxu0 %v1328_v1 }
 0x4d9   :  { %1248 = vmatpush3.msra.mxu0 %v1475_v12 }
 0x4da   :  { %1249 = vmatprep.subr.mxu0 %v1328_v1 }
 0x4db   :  { %1250 = vmatpush3.msra.mxu0 %v1484_v13 }
 0x4dc   :  { %1251 = vmatprep.subr.mxu0 %v1328_v1 }
 0x4dd   :  { %1252 = vmatpush3.msra.mxu0 %v1493_v14 }
 0x4de   :  { %1253 = vmatprep.subr.mxu0 %v1328_v1 }
 0x4df   :  { %1254 = vmatpush3.msra.mxu0 %v1502_v15 }
 0x4e0   :  { %1255 = vmatprep.subr.mxu0 %v1328_v1  ;;  %v657_v1 = vld [vmem:[%s656_s26] sm:$0x1] }
 0x4e1   :  { %1256 = vmatpush3.msra.mxu0 %v1511_v16 }
 0x582   :  { %v561_v59 = vpop.f32.mrf.mxu0 }
 0x583   :  { %v565_v60 = vadd.f32 %v561_v59, %v494_v58 }
 0x584   :  { %v1189_v61 = vpop.f32.mrf.mxu0 }
 0x585   :  { %1223 = vmatmul.mubr.f32.vlgmr.msra.gmra.mxu1 %v565_v60  ;;  %1258 = vmatmul.mubr.f32.vlgmr.msra.gmra.mxu0 %v565_v60 }
 0x645   :  { %v651_v2 = vpop.f32.mrf.mxu1  ;;  %v724_v3 = vpop.f32.mrf.mxu0 }
 0x646   :  { %v655_v4 = vadd.f32 %v651_v2, %v568_v0  ;;  %v728_v5 = vadd.f32 %v724_v3, %v657_v1 }
 0x647   :  { %v1224_v6 = vpop.f32.mrf.mxu1  ;;  %v1259_v7 = vpop.f32.mrf.mxu0 }
 0x648   :  { %729 = vst [vmem:[#allocation6] sm:$0x1] %v728_v5  ;;  %v733_v8 = vsel %vm732_vm1, %v655_v4, -1e+30 }
 0x649   :  { %v735_v9 = vsel %vm734_vm2, %v733_v8, -inf }
 0x64a   :  { %736 = vmax.xlane.f32.xlu0 %v735_v9 }
 0x6d3   :  { %v737_v10 = vpop.xlane.xlu0 %736 }
 0x6d4   :  { %v738_v11 = vsub.f32 %v733_v8, %v737_v10 }
 0x6d6   :  { %v739_v12 = vmul.f32 1.442695, %v738_v11 }
 0x6d8   :  { %1265 = vpow2.f32 %v739_v12 }
 0x6e5   :  { %v1266_v13 = vpop.eup %1265 }
 0x6e6   :  { %v741_v14 = vsel %vm734_vm2, %v1266_v13, 0.0 }
 0x6e7   :  { %742 = vadd.xlane.f32.xlu0 %v741_v14 }
 0x6e8   :  { %1292 = shalt.err (!%p1289_p9)
}
 0x6e9   :  { %767 = dma.vmem_to_hbm [thread:$0]  %s765_s3, 16, %s1836_s7, [#allocation7]  }
 0x6ea   :  { %s1331_s0 = smov [#allocation4]  }
 0x6eb   :  { %s754_s8 = sshll.u32 %s1331_s0, 4  ;;  %s755_s8 = int_to_ptr.vmem [resolvable:$true] %s754_s8 }
 0x6ec   :  { %s1301_s9 = scalar_lea.vmem %s755_s8, 16  ;;  %s1305_s10 = scalar_lea.vmem %s755_s8, 32 }
 0x6ed   :  { %p1302_p10 = scmp.ne.s32.totalorder %s755_s8, %s1301_s9  ;;  %p1306_p11 = scmp.lt.s32.totalorder %s755_s8, %s755_s8 }
 0x6ee   :  { %p1307_p12 = scmp.lt.s32.totalorder %s1305_s10, %s1301_s9 }
 0x6f0   :  { %p1308_p13 = por %p1307_p12, %p1306_p11 }
 0x6f2   :  { %p1309_p0 = pnand %p1308_p13, %p1302_p10 }
 0x770   :  { %v743_v15 = vpop.xlane.xlu0 %742 }
 0x771   :  { %1267 = vlog2.f32 %v743_v15 }
 0x77e   :  { %v1268_v16 = vpop.eup %1267 }
 0x77f   :  { %v745_v17 = vmul.f32 0.6931472, %v1268_v16 }
 0x781   :  { %v746_v18 = vsub.f32 %v738_v11, %v745_v17 }
 0x783   :  { %747 = vst [vmem:[#allocation4] sm:$0x1] %v746_v18 }
 0x784   :  { %1312 = shalt.err (!%p1309_p0)
}
 0x785   :  { %757 = dma.vmem_to_hbm [thread:$0]  %s755_s8, 16, %s1835_s6, [#allocation5]  }
 0x786   :  { %1323 = dma.done.wait [#allocation5], 16  }
 0x787   :  { %1324 = vsyncadd [#allocation5], 4294967280 }
 0x788   :  { %1325 = dma.done.wait [#allocation7], 16  }
 0x789   :  { %1326 = vsyncadd [#allocation7], 4294967280 }
 0x78a   :  { %774 = vsyncpa [#allocation5], 1 }
 0x78b   :  { %775 = vsyncpa [#allocation7], 1 }

</bundles_post_ra>
